<compile_context>
chip_gen: v6e
topology: v6e:2x2x1
jax: 0.10.0
libtpu: 0.0.40
codegen_flags: <defaults>
</compile_context>

<pallas_src>
import jax
import jax.numpy as jnp
from jax.experimental import pallas as pl
from jax.experimental.pallas import tpu as pltpu


def _swish_kernel(x_ref, o_ref):
    x = x_ref[...]
    # Compute in f32 (matches torch F.sigmoid on f32 inputs). For bf16 inputs
    # this is an in-vreg upcast only -- HBM traffic stays in the storage dtype.
    xf = x.astype(jnp.float32)
    o_ref[...] = (xf * jax.nn.sigmoid(xf)).astype(o_ref.dtype)


_LANE_CANDIDATES = (4096, 2048, 1024, 512, 256, 128)
_SPLIT_THRESHOLD_BYTES = 256 * 1024   # above this, force multiple grid steps
_MIN_BLOCKS = 4                        # pipelining + both v7x TensorCores


def _target_block_bytes() -> int:
    """Generation-aware per-block byte target.

    v6e/v7x: ~4 MiB (input+output double buffering = 16 MiB, under their
    32 MiB scoped-VMEM defaults and v7x's 64 MiB physical VMEM, and v7x's
    ~3.2 TB/s HBM makes the fixed per-step overhead relatively larger so
    bigger blocks pay off). v5e (and anything unrecognized): 2 MiB, so the
    4 live buffers (8 MiB) stay well under v5e's 16 MiB scoped-VMEM default.
    """
    try:
        kind = jax.devices()[0].device_kind.lower()
    except Exception:  # interpret mode / no devices visible
        kind = ""
    if ("v6" in kind) or ("v7" in kind):
        return 4 * 1024 * 1024
    return 2 * 1024 * 1024


def _choose_layout(n: int, itemsize: int):
    """Pick (lane, rows, tile_rows, grid) for a flat array of n elements.

    n must be a multiple of 128 (caller guarantees this).
    """
    lane = 128
    for cand in _LANE_CANDIDATES:
        if n % cand == 0:
            lane = cand
            break
    rows = n // lane

    # Sublane granularity is dtype-aware: packed dtypes need taller tiles
    # (8 rows for 4-byte, 16 for 2-byte, 32 for 1-byte elements).
    granule = max(8, 32 // max(1, itemsize))

    block_bytes = _target_block_bytes()
    target_rows = max(granule,
                      (block_bytes // (lane * itemsize)) // granule * granule)

    slab_bytes = rows * lane * itemsize
    if slab_bytes > _SPLIT_THRESHOLD_BYTES and rows >= 2 * granule:
        # Always emit multiple grid steps: restores DMA/compute/writeback
        # overlap and shards the "parallel" axis across both v7x TCs. The
        # last block may be partial; that is safe because the op is purely
        # elementwise and out-of-bounds rows are never written back.
        cap = max(granule, (rows // _MIN_BLOCKS) // granule * granule)
        tile_rows = max(granule, min(target_rows, cap))
        return lane, rows, tile_rows, pl.cdiv(rows, tile_rows)

    # Tiny slab: single full-extent block (block_shape == array shape, so no
    # (8,128) divisibility requirement); splitting would only add per-step
    # overhead without hiding anything.
    return lane, rows, rows, 1


def swish(x: jnp.ndarray) -> jnp.ndarray:
    """Elementwise Swish (x * sigmoid(x)) via Pallas. Any float shape/dtype.

    Note: f64 inputs are computed in f32 on TPU.
    """
    # TODO(synk): torch's in_place=True path (x.mul_) has no JAX equivalent
    # (arrays are immutable); the functional result is identical.
    orig_shape = x.shape
    dtype = x.dtype
    n = x.size
    itemsize = jnp.dtype(dtype).itemsize

    x_flat = x.reshape(-1)
    pad = (-n) % 128
    if pad:
        # Rare path: only when the element count is not a multiple of 128.
        # swish(0) == 0, so zero padding is numerically safe.
        x_flat = jnp.pad(x_flat, (0, pad))
    n_eff = n + pad

    lane, rows, tile_rows, grid = _choose_layout(n_eff, itemsize)
    x2d = x_flat.reshape(rows, lane)

    # Explicit scoped-VMEM budget: ~6 live block buffers of headroom, never
    # below the 16 MiB v5e default, never above 48 MiB (v7x physical VMEM is
    # 64 MiB per TensorCore).
    block_bytes_actual = tile_rows * lane * itemsize
    vmem_limit = int(min(48 << 20, max(16 << 20, 6 * block_bytes_actual)))

    y2d = pl.pallas_call(
        _swish_kernel,
        out_shape=jax.ShapeDtypeStruct((rows, lane), dtype),
        grid_spec=pltpu.PrefetchScalarGridSpec(
            num_scalar_prefetch=0,
            grid=(grid,),
            in_specs=[pl.BlockSpec((tile_rows, lane), lambda i: (i, 0))],
            out_specs=pl.BlockSpec((tile_rows, lane), lambda i: (i, 0)),
        ),
        compiler_params=pltpu.CompilerParams(
            dimension_semantics=("parallel",),
            vmem_limit_bytes=vmem_limit,
        ),
    )(x2d)

    y_flat = y2d.reshape(-1)
    if pad:
        y_flat = y_flat[:n]
    return y_flat.reshape(orig_shape)


if __name__ == "__main__":
    key = jax.random.PRNGKey(0)
    k1, k2 = jax.random.split(key)

    # Small NCHW-like activation tensor as seen by Swish inside Squeezeformer.
    x = jax.random.normal(k1, (2, 4, 16, 16), dtype=jnp.float32)
    y = swish(x)
    jax.block_until_ready(y)
    y_ref = x * jax.nn.sigmoid(x)
    assert y.shape == x.shape and y.dtype == x.dtype
    assert jnp.allclose(y, y_ref, atol=1e-6, rtol=1e-6)

    # Second (still small) tensor that exercises the multi-block path with a
    # partial last block (rows=30, tile_rows=8 -> grid of 4 steps).
    x2 = jax.random.normal(k2, (2, 4, 15, 1024), dtype=jnp.float32)
    y2 = swish(x2)
    jax.block_until_ready(y2)
    y2_ref = x2 * jax.nn.sigmoid(x2)
    assert y2.shape == x2.shape and y2.dtype == x2.dtype
    assert jnp.allclose(y2, y2_ref, atol=1e-6, rtol=1e-6)

    print("KERNEL_OK")
</pallas_src>

<mosaic_0001>
module attributes {stable_mosaic.version = 11 : i64} {
  func.func @_swish_kernel(%arg0: i32, %arg1: memref<1x2048xf32, #tpu.memory_space<vmem>>, %arg2: memref<1x2048xf32, #tpu.memory_space<vmem>>) attributes {dimension_semantics = [#tpu.dimension_semantics<parallel>], iteration_bounds = array<i64: 1>, scalar_prefetch = 0 : i64, scratch_operands = 0 : i64, tpu.core_type = #tpu.core_type<tc>, window_params = [{transform_indices = @transform_0, window_bounds = array<i64: 1, 2048>}, {transform_indices = @transform_1, window_bounds = array<i64: 1, 2048>}]} {
    %c0 = arith.constant 0 : index
    %c0_0 = arith.constant 0 : index
    %0 = vector.load %arg1[%c0, %c0_0] : memref<1x2048xf32, #tpu.memory_space<vmem>>, vector<1x2048xf32>
    %1 = arith.negf %0 : vector<1x2048xf32>
    %2 = math.exp %1 : vector<1x2048xf32>
    %cst = arith.constant 1.000000e+00 : f32
    %3 = vector.broadcast %cst : f32 to vector<1x2048xf32>
    %4 = arith.addf %3, %2 : vector<1x2048xf32>
    %5 = arith.divf %3, %4 : vector<1x2048xf32>
    %6 = arith.mulf %0, %5 : vector<1x2048xf32>
    %c0_1 = arith.constant 0 : index
    %c0_2 = arith.constant 0 : index
    %7 = vector.load %arg2[%c0_1, %c0_2] : memref<1x2048xf32, #tpu.memory_space<vmem>>, vector<1x2048xf32>
    tpu.vector_store %arg2[%c0_1, %c0_2], %6 {strides = array<i32>} : memref<1x2048xf32, #tpu.memory_space<vmem>>, vector<1x2048xf32>,
    return
  }
  func.func @transform_0(%arg0: i32) -> (i32, i32) {
    %c0_i32 = arith.constant 0 : i32
    %c0_i32_0 = arith.constant 0 : i32
    return %arg0, %c0_i32 : i32, i32
  }
  func.func @transform_1(%arg0: i32) -> (i32, i32) {
    %c0_i32 = arith.constant 0 : i32
    %c0_i32_0 = arith.constant 0 : i32
    return %arg0, %c0_i32 : i32, i32
  }
}

</mosaic_0001>

<bundles_post_ra>
// kernel: tpu_custom_call.1
= control target key start
LH: loop header
LB: loop body
LE: loop exit
PB: predicated region body
PF: predicated region fallthrough
CT: control target
= control target key end

     0   :  { %6 = vsyncpa [#allocation3], 0  ;;  %s128_s0 = inlined_call_operand.hbm [shape: f32[1,2048], index: 0, kind: input, shape index: {}]   ;;  %s129_s1 = inlined_call_operand.hbm [shape: f32[1,2048], index: 1, kind: output, shape index: {}]  }
   0x1   :  { %7 = vsyncpa [#allocation4], 0  ;;  %s110_s6 = smov [#allocation2]  }
   0x2   :  { %s14_s7 = sshll.u32 %s110_s6, 4  ;;  %s15_s7 = int_to_ptr.vmem [resolvable:$true] %s14_s7 }
   0x3   :  { %s74_s8 = scalar_lea.vmem %s15_s7, 256  ;;  %p79_p1 = scmp.lt.s32.totalorder %s15_s7, %s15_s7 }
   0x4   :  { %p75_p0 = scmp.ne.s32.totalorder %s15_s7, %s74_s8  ;;  %p80_p2 = scmp.lt.s32.totalorder %s74_s8, %s74_s8 }
   0x6   :  { %p81_p3 = por %p80_p2, %p79_p1 }
   0x8   :  { %p82_p4 = pnand %p81_p3, %p75_p0 }
   0xa   :  { %85 = shalt.err (!%p82_p4)
}
   0xb   :  { %17 = dma.hbm_to_vmem [thread:$0]  %s128_s0, 256, %s15_s7, [#allocation3]  }
   0xc   :  { %106 = dma.done.wait [#allocation3], 256  }
   0xd   :  { %107 = vsyncadd [#allocation3], 4294967040  ;;  %v21_v0 = vld [vmem:[#allocation2] sm:$0xff]  ;;  %v22_v1 = vld [vmem:[#allocation2 + $0x8] sm:$0xff]  ;;  %s111_s11 = smov [#allocation5]  }
   0xe   :  { %v54_v2 = vmul.f32 -1.442695, %v21_v0  ;;  %v55_v3 = vmul.f32 -1.442695, %v22_v1  ;;  %s45_s12 = sshll.u32 %s111_s11, 4  ;;  %s46_s12 = int_to_ptr.vmem [resolvable:$true] %s45_s12 }
   0xf   :  { %s86_s0 = scalar_lea.vmem %s46_s12, 256  ;;  %p91_p6 = scmp.lt.s32.totalorder %s46_s12, %s46_s12 }
  0x10   :  { %58 = vpow2.f32 %v54_v2  ;;  %p87_p5 = scmp.ne.s32.totalorder %s46_s12, %s86_s0  ;;  %p92_p7 = scmp.lt.s32.totalorder %s86_s0, %s86_s0 }
  0x11   :  { %60 = vpow2.f32 %v55_v3 }
  0x12   :  { %p93_p8 = por %p92_p7, %p91_p6 }
  0x14   :  { %p94_p9 = pnand %p93_p8, %p87_p5 }
  0x1d   :  { %v59_v4 = vpop.eup %58 }
  0x1e   :  { %v61_v5 = vpop.eup %60  ;;  %v29_v6 = vadd.f32 1.0, %v59_v4 }
  0x1f   :  { %v30_v7 = vadd.f32 1.0, %v61_v5 }
  0x20   :  { %62 = vrcp.f32 %v29_v6 }
  0x21   :  { %64 = vrcp.f32 %v30_v7 }
  0x2d   :  { %v63_v8 = vpop.eup %62 }
  0x2e   :  { %v65_v9 = vpop.eup %64  ;;  %v35_v10 = vmul.f32 %v63_v8, %v21_v0 }
  0x2f   :  { %v36_v11 = vmul.f32 %v65_v9, %v22_v1 }
  0x30   :  { %37 = vst [vmem:[#allocation5] sm:$0xff] %v35_v10 }
  0x31   :  { %38 = vst [vmem:[#allocation5 + $0x8] sm:$0xff] %v36_v11 }
  0x32   :  { %97 = shalt.err (!%p94_p9)
}
  0x33   :  { %48 = dma.vmem_to_hbm [thread:$0]  %s46_s12, 256, %s129_s1, [#allocation4]  }
  0x34   :  { %108 = dma.done.wait [#allocation4], 256  }
  0x35   :  { %109 = vsyncadd [#allocation4], 4294967040 }
  0x36   :  { %52 = vsyncpa [#allocation3], 1 }
  0x37   :  { %53 = vsyncpa [#allocation4], 1 }

</bundles_post_ra>
